<compile_context>
chip_gen: v6e
topology: v6e:2x2x1
jax: 0.10.0
libtpu: 0.0.40
codegen_flags: <defaults>
</compile_context>

<pallas_src>
import functools

import jax
import jax.numpy as jnp
from jax.experimental import pallas as pl
from jax.experimental.pallas import tpu as pltpu

# DQN for a classic-control env (e.g. CartPole): N_STATES=4, N_ACTIONS=2, hidden=50.
N_STATES = 4
N_ACTIONS = 2
HIDDEN = 50

HIDDEN_PAD = 64     # lane/sublane-friendly padding of the hidden dim
OUT_PAD = 128       # lane-dense output width (N_ACTIONS live in lanes 0..1)
TB_MAX = 4096       # per-block row cap; sized for v5e's 16 MiB scoped VMEM
BUCKETS = (8, 32, 128, 512, 2048)  # batch buckets -> bounded # of compiled variants


def _round_up(n, m):
    return ((n + m - 1) // m) * m


def _bucket_batch(b):
    for bb in BUCKETS:
        if b <= bb:
            return bb
    return _round_up(b, BUCKETS[-1])


def net_kernel(x_ref, w1_ref, b1_ref, w2_ref, b2_ref, o_ref):
    # fc1: (tb, N_STATES) @ (N_STATES, HIDDEN_PAD) on the MXU, f32 accumulation.
    h = jnp.dot(x_ref[...], w1_ref[...], preferred_element_type=jnp.float32)
    h = jnp.maximum(h + b1_ref[...], 0.0)                       # bias + ReLU
    # out layer: (tb, HIDDEN_PAD) @ (HIDDEN_PAD, OUT_PAD) on the MXU.
    y = jnp.dot(h, w2_ref[...], preferred_element_type=jnp.float32) + b2_ref[...]
    o_ref[...] = y.astype(o_ref.dtype)                          # lane-dense store


def pad_params(w1, b1, w2, b2):
    """Pad params ONCE to MXU/lane-aligned shapes. w1:(N_STATES,HIDDEN),
    b1:(1,HIDDEN), w2:(HIDDEN,N_ACTIONS), b2:(1,N_ACTIONS). Padded regions must
    remain zero after any parameter update for the kernel output to stay exact."""
    w1_p = jnp.zeros((N_STATES, HIDDEN_PAD), jnp.float32).at[:, :HIDDEN].set(w1)
    b1_p = jnp.zeros((1, HIDDEN_PAD), jnp.float32).at[:, :HIDDEN].set(b1)
    w2_p = jnp.zeros((HIDDEN_PAD, OUT_PAD), jnp.float32).at[:HIDDEN, :N_ACTIONS].set(w2)
    b2_p = jnp.zeros((1, OUT_PAD), jnp.float32).at[:, :N_ACTIONS].set(b2)
    return w1_p, b1_p, w2_p, b2_p


@jax.jit
def _net_forward_padded(x_p, w1_p, b1_p, w2_p, b2_p):
    """x_p: (Bp, N_STATES) with Bp a bucketed multiple of 8. Pre-padded params.
    Returns (Bp, OUT_PAD); caller slices to (B, N_ACTIONS)."""
    bp = x_p.shape[0]
    if bp <= TB_MAX:
        tb = bp                                    # single block, grid=(1,)
        b_pad = bp
    else:
        n_blocks = pl.cdiv(bp, TB_MAX)             # split evenly, no 2x pad blow-up
        tb = _round_up(-(-bp // n_blocks), 8)
        b_pad = _round_up(bp, tb)
    if b_pad != bp:
        x_p = jnp.zeros((b_pad, N_STATES), x_p.dtype).at[:bp].set(x_p)

    grid = (b_pad // tb,)
    out_p = pl.pallas_call(
        net_kernel,
        out_shape=jax.ShapeDtypeStruct((b_pad, OUT_PAD), jnp.float32),
        grid=grid,
        in_specs=[
            pl.BlockSpec((tb, N_STATES), lambda i: (i, 0)),          # x: blocked over batch
            pl.BlockSpec((N_STATES, HIDDEN_PAD), lambda i: (0, 0)),  # w1: VMEM-resident
            pl.BlockSpec((1, HIDDEN_PAD), lambda i: (0, 0)),         # b1
            pl.BlockSpec((HIDDEN_PAD, OUT_PAD), lambda i: (0, 0)),   # w2
            pl.BlockSpec((1, OUT_PAD), lambda i: (0, 0)),            # b2
        ],
        out_specs=pl.BlockSpec((tb, OUT_PAD), lambda i: (i, 0)),
        compiler_params=pltpu.CompilerParams(
            dimension_semantics=("parallel",)),
    )(x_p, w1_p, b1_p, w2_p, b2_p)
    return out_p


def net_forward(x, padded_params):
    """x: (B, N_STATES) f32. padded_params: output of pad_params().
    Returns (B, N_ACTIONS) action values."""
    b = x.shape[0]
    bp = _bucket_batch(b)
    if bp != b:
        # Pad batch to the bucket size (padded rows are zero; their outputs are
        # sliced away below, so this is semantically inert).
        x = jnp.zeros((bp, N_STATES), x.dtype).at[:b].set(x)
    out_p = _net_forward_padded(x, *padded_params)
    return out_p[:b, :N_ACTIONS]


def init_params(key):
    k1, k2, k3, k4 = jax.random.split(key, 4)
    # PyTorch module overrides weights with normal(0, 0.1).
    fc1_w = 0.1 * jax.random.normal(k1, (HIDDEN, N_STATES), jnp.float32)
    out_w = 0.1 * jax.random.normal(k2, (N_ACTIONS, HIDDEN), jnp.float32)
    # Biases keep PyTorch's default uniform(-1/sqrt(fan_in), 1/sqrt(fan_in)).
    fc1_b = jax.random.uniform(
        k3, (HIDDEN,), jnp.float32, -1.0 / jnp.sqrt(N_STATES), 1.0 / jnp.sqrt(N_STATES))
    out_b = jax.random.uniform(
        k4, (N_ACTIONS,), jnp.float32, -1.0 / jnp.sqrt(HIDDEN), 1.0 / jnp.sqrt(HIDDEN))
    # Glue: transpose weights to (in, out) and make biases 2-D (1, out).
    w1 = fc1_w.T                      # (N_STATES, HIDDEN)
    b1 = fc1_b.reshape(1, HIDDEN)
    w2 = out_w.T                      # (HIDDEN, N_ACTIONS)
    b2 = out_b.reshape(1, N_ACTIONS)
    return w1, b1, w2, b2


if __name__ == "__main__":
    key = jax.random.PRNGKey(0)
    pkey, xkey = jax.random.split(key)
    w1, b1, w2, b2 = init_params(pkey)
    padded_params = pad_params(w1, b1, w2, b2)   # pad once, reuse every call

    B = 2
    x = jax.random.normal(xkey, (B, N_STATES), jnp.float32)

    actions_value = net_forward(x, padded_params)
    jax.block_until_ready(actions_value)

    # Pure-JAX reference check of the same forward pass (unpadded params).
    ref = jnp.maximum(x @ w1 + b1, 0.0) @ w2 + b2
    assert actions_value.shape == (B, N_ACTIONS)
    assert jnp.allclose(actions_value, ref, atol=1e-5, rtol=1e-5)

    print("KERNEL_OK")
</pallas_src>

<mosaic_0001>
module attributes {stable_mosaic.version = 11 : i64} {
  func.func @net_kernel(%arg0: i32, %arg1: memref<8x4xf32, #tpu.memory_space<vmem>>, %arg2: memref<4x64xf32, #tpu.memory_space<vmem>>, %arg3: memref<1x64xf32, #tpu.memory_space<vmem>>, %arg4: memref<64x128xf32, #tpu.memory_space<vmem>>, %arg5: memref<1x128xf32, #tpu.memory_space<vmem>>, %arg6: memref<8x128xf32, #tpu.memory_space<vmem>>) attributes {dimension_semantics = [#tpu.dimension_semantics<parallel>], iteration_bounds = array<i64: 1>, scalar_prefetch = 0 : i64, scratch_operands = 0 : i64, tpu.core_type = #tpu.core_type<tc>, window_params = [{transform_indices = @transform_0, window_bounds = array<i64: 8, 4>}, {pipeline_mode = #tpu.pipeline_mode<synchronous>, transform_indices = @transform_1, window_bounds = array<i64: 4, 64>}, {pipeline_mode = #tpu.pipeline_mode<synchronous>, transform_indices = @transform_2, window_bounds = array<i64: 1, 64>}, {pipeline_mode = #tpu.pipeline_mode<synchronous>, transform_indices = @transform_3, window_bounds = array<i64: 64, 128>}, {pipeline_mode = #tpu.pipeline_mode<synchronous>, transform_indices = @transform_4, window_bounds = array<i64: 1, 128>}, {transform_indices = @transform_5, window_bounds = array<i64: 8, 128>}]} {
    %c0 = arith.constant 0 : index
    %c0_0 = arith.constant 0 : index
    %0 = vector.load %arg1[%c0, %c0_0] : memref<8x4xf32, #tpu.memory_space<vmem>>, vector<8x4xf32>
    %c0_1 = arith.constant 0 : index
    %c0_2 = arith.constant 0 : index
    %1 = vector.load %arg2[%c0_1, %c0_2] : memref<4x64xf32, #tpu.memory_space<vmem>>, vector<4x64xf32>
    %cst = arith.constant dense<0.000000e+00> : vector<8x64xf32>
    %2 = tpu.matmul %0, %1, %cst {dimension_numbers = #tpu.dot_dimension_numbers<[1], [0], [0], [1], [0, 0, 1, 1], [], []>} : vector<8x4xf32>, vector<4x64xf32>, vector<8x64xf32> -> vector<8x64xf32>
    %c0_3 = arith.constant 0 : index
    %c0_4 = arith.constant 0 : index
    %3 = vector.load %arg3[%c0_3, %c0_4] : memref<1x64xf32, #tpu.memory_space<vmem>>, vector<1x64xf32>
    %4 = vector.broadcast %3 : vector<1x64xf32> to vector<8x64xf32>
    %5 = arith.addf %2, %4 : vector<8x64xf32>
    %cst_5 = arith.constant 0.000000e+00 : f32
    %6 = vector.broadcast %cst_5 : f32 to vector<8x64xf32>
    %7 = arith.maximumf %5, %6 : vector<8x64xf32>
    %c0_6 = arith.constant 0 : index
    %c0_7 = arith.constant 0 : index
    %8 = vector.load %arg4[%c0_6, %c0_7] : memref<64x128xf32, #tpu.memory_space<vmem>>, vector<64x128xf32>
    %cst_8 = arith.constant dense<0.000000e+00> : vector<8x128xf32>
    %9 = tpu.matmul %7, %8, %cst_8 {dimension_numbers = #tpu.dot_dimension_numbers<[1], [0], [0], [1], [0, 0, 1, 1], [], []>} : vector<8x64xf32>, vector<64x128xf32>, vector<8x128xf32> -> vector<8x128xf32>
    %c0_9 = arith.constant 0 : index
    %c0_10 = arith.constant 0 : index
    %10 = vector.load %arg5[%c0_9, %c0_10] : memref<1x128xf32, #tpu.memory_space<vmem>>, vector<1x128xf32>
    %11 = vector.broadcast %10 : vector<1x128xf32> to vector<8x128xf32>
    %12 = arith.addf %9, %11 : vector<8x128xf32>
    %c0_11 = arith.constant 0 : index
    %c0_12 = arith.constant 0 : index
    %13 = vector.load %arg6[%c0_11, %c0_12] : memref<8x128xf32, #tpu.memory_space<vmem>>, vector<8x128xf32>
    tpu.vector_store %arg6[%c0_11, %c0_12], %12 {strides = array<i32>} : memref<8x128xf32, #tpu.memory_space<vmem>>, vector<8x128xf32>,
    return
  }
  func.func @transform_0(%arg0: i32) -> (i32, i32) {
    %c0_i32 = arith.constant 0 : i32
    %c0_i32_0 = arith.constant 0 : i32
    return %arg0, %c0_i32 : i32, i32
  }
  func.func @transform_1(%arg0: i32) -> (i32, i32) {
    %c0_i32 = arith.constant 0 : i32
    %c0_i32_0 = arith.constant 0 : i32
    %c0_i32_1 = arith.constant 0 : i32
    return %c0_i32, %c0_i32_0 : i32, i32
  }
  func.func @transform_2(%arg0: i32) -> (i32, i32) {
    %c0_i32 = arith.constant 0 : i32
    %c0_i32_0 = arith.constant 0 : i32
    %c0_i32_1 = arith.constant 0 : i32
    return %c0_i32, %c0_i32_0 : i32, i32
  }
  func.func @transform_3(%arg0: i32) -> (i32, i32) {
    %c0_i32 = arith.constant 0 : i32
    %c0_i32_0 = arith.constant 0 : i32
    %c0_i32_1 = arith.constant 0 : i32
    return %c0_i32, %c0_i32_0 : i32, i32
  }
  func.func @transform_4(%arg0: i32) -> (i32, i32) {
    %c0_i32 = arith.constant 0 : i32
    %c0_i32_0 = arith.constant 0 : i32
    %c0_i32_1 = arith.constant 0 : i32
    return %c0_i32, %c0_i32_0 : i32, i32
  }
  func.func @transform_5(%arg0: i32) -> (i32, i32) {
    %c0_i32 = arith.constant 0 : i32
    %c0_i32_0 = arith.constant 0 : i32
    return %arg0, %c0_i32 : i32, i32
  }
}

</mosaic_0001>

<bundles_post_ra>
// kernel: _net_forward_padded.1
= control target key start
LH: loop header
LB: loop body
LE: loop exit
PB: predicated region body
PF: predicated region fallthrough
CT: control target
= control target key end

     0   :  { %10 = vsyncpa [#allocation3], 0  ;;  %s372_s0 = inlined_call_operand.vmem [shape: f32[8,4], index: 0, kind: input, shape index: {}]   ;;  %s373_s1 = inlined_call_operand.vmem [shape: f32[4,64], index: 1, kind: input, shape index: {}]   ;;  %s374_s2 = inlined_call_operand.vmem [shape: f32[1,64], index: 2, kind: input, shape index: {}]   ;;  %s375_s3 = inlined_call_operand.hbm [shape: f32[64,128], index: 3, kind: input, shape index: {}]   ;;  %s376_s4 = inlined_call_operand.vmem [shape: f32[1,128], index: 4, kind: input, shape index: {}]   ;;  %s377_s5 = inlined_call_operand.hbm [shape: f32[8,128], index: 5, kind: output, shape index: {}]  }
   0x1   :  { %11 = vsyncpa [#allocation4], 0  ;;  %s318_s18 = smov [#allocation2]  }
   0x2   :  { %s23_s19 = sshll.u32 %s318_s18, 4  ;;  %s24_s19 = int_to_ptr.vmem [resolvable:$true] %s23_s19 }
   0x3   :  { %s282_s20 = scalar_lea.vmem %s24_s19, 1024  ;;  %p287_p1 = scmp.lt.s32.totalorder %s24_s19, %s24_s19 }
   0x4   :  { %p283_p0 = scmp.ne.s32.totalorder %s24_s19, %s282_s20  ;;  %p288_p2 = scmp.lt.s32.totalorder %s282_s20, %s282_s20 }
   0x6   :  { %p289_p3 = por %p288_p2, %p287_p1 }
   0x8   :  { %p290_p4 = pnand %p289_p3, %p283_p0 }
   0xa   :  { %293 = shalt.err (!%p290_p4)
}
   0xb   :  { %s319_s21 = smov 128   ;;  %s320_s22 = smov 8  }
   0xc   :  { %29 = dma.hbm_to_vmem [thread:$0]  %s375_s3, 1024, %s24_s19, [#allocation3], %s319_s21, %s319_s21, %s320_s22  }
   0xd   :  { %314 = dma.done.wait [#allocation3], 1024  }
   0xe   :  { %315 = vsyncadd [#allocation3], 4294966272  ;;  %v321_v0 = vmov 0.0   ;;  %vm322_vm0 = vmmov 0   ;;  %vm48_vm1 = vcmask 1043456   ;;  %vm44_vm2 = vcmask 31744  }
   0xf   :  { %244 = vmatprep.subr.mxu0 %v321_v0  ;;  %246 = vmatprep.mubr.msk.f32.mxu0 %vm322_vm0, %v321_v0  ;;  %v36_v1 = vld [vmem:[%s373_s1] sm:$0xf]  ;;  %v130_v3 = vld [vmem:[#allocation2 + $0x38] sm:$0xff]  ;;  %v129_v4 = vld [vmem:[#allocation2 + $0x30] sm:$0xff]  ;;  %vm138_vm3 = vcmask 523264   ;;  %s323_s30 = smov [#allocation5]  }
  0x10   :  { %249 = vmatprep.subr.mxu1 %v321_v0  ;;  %265 = vmatprep.mubr.msk.f32.mxu1 %vm322_vm0, %v321_v0  ;;  %v35_v2 = vld [vmem:[%s372_s0] sm:$0xff]  ;;  %v128_v5 = vld [vmem:[#allocation2 + $0x28] sm:$0xff]  ;;  %v126_v7 = vld [vmem:[#allocation2 + $0x18] sm:$0xff]  ;;  %s219_s6 = sshll.u32 %s323_s30, 4  ;;  %s220_s6 = int_to_ptr.vmem [resolvable:$true] %s219_s6 }
  0x11   :  { %245 = vmatpush3.msk.msra.mxu0 %vm48_vm1, %v36_v1  ;;  %250 = vmatpush3.msra.mxu1 %v130_v3  ;;  %v127_v6 = vld [vmem:[#allocation2 + $0x20] sm:$0xff]  ;;  %v125_v8 = vld [vmem:[#allocation2 + $0x10] sm:$0xff]  ;;  %v124_v9 = vld [vmem:[#allocation2 + $0x8] sm:$0xff]  ;;  %s294_s7 = scalar_lea.vmem %s220_s6, 128  ;;  %p299_p6 = scmp.lt.s32.totalorder %s220_s6, %s220_s6 }
  0x12   :  { %247 = vmatmul.mubr.msk.f32.vlgmr.msra.gmra.mxu0 %vm44_vm2, %v35_v2  ;;  %251 = vmatprep.subr.mxu1 %v321_v0  ;;  %v123_v10 = vld [vmem:[#allocation2] sm:$0xff]  ;;  %p295_p5 = scmp.ne.s32.totalorder %s220_s6, %s294_s7  ;;  %p300_p7 = scmp.lt.s32.totalorder %s294_s7, %s294_s7 }
  0x13   :  { %252 = vmatpush3.msra.mxu1 %v129_v4  ;;  %v228_v11 = vld [vmem:[%s374_s2] ss:$0 sm:$0xff] }
  0x14   :  { %253 = vmatprep.subr.mxu1 %v321_v0  ;;  %v231_v16 = vld [vmem:[%s376_s4] ss:$0 sm:$0xff]  ;;  %p301_p8 = por %p300_p7, %p299_p6 }
  0x15   :  { %254 = vmatpush3.msra.mxu1 %v128_v5 }
  0x16   :  { %255 = vmatprep.subr.mxu1 %v321_v0  ;;  %p302_p9 = pnand %p301_p8, %p295_p5 }
  0x17   :  { %256 = vmatpush3.msra.mxu1 %v127_v6 }
  0x18   :  { %257 = vmatprep.subr.mxu1 %v321_v0 }
  0x19   :  { %258 = vmatpush3.msra.mxu1 %v126_v7 }
  0x1a   :  { %259 = vmatprep.subr.mxu1 %v321_v0 }
  0x1b   :  { %260 = vmatpush3.msra.mxu1 %v125_v8 }
  0x1c   :  { %261 = vmatprep.subr.mxu1 %v321_v0 }
  0x1d   :  { %262 = vmatpush3.msra.mxu1 %v124_v9 }
  0x1e   :  { %263 = vmatprep.subr.mxu1 %v321_v0 }
  0x1f   :  { %264 = vmatpush3.msra.mxu1 %v123_v10 }
  0xd2   :  { %v118_v12 = vpop.f32.mrf.mxu0 }
  0xd3   :  { %v119_v13 = vadd.f32 %v228_v11, %v118_v12 }
  0xd4   :  { %v248_v14 = vpop.f32.mrf.mxu0 }
  0xd5   :  { %v122_v15 = vmax.f32 %v119_v13, 0.0 }
  0xd7   :  { %266 = vmatmul.mubr.msk.f32.vlgmr.msra.gmra.mxu1 %vm138_vm3, %v122_v15 }
 0x197   :  { %v208_v17 = vpop.f32.mrf.mxu1 }
 0x198   :  { %v209_v18 = vadd.f32 %v231_v16, %v208_v17 }
 0x199   :  { %v267_v19 = vpop.f32.mrf.mxu1 }
 0x19a   :  { %212 = vst [vmem:[#allocation5] sm:$0xff] %v209_v18 }
 0x19b   :  { %305 = shalt.err (!%p302_p9)
}
 0x19c   :  { %222 = dma.vmem_to_hbm [thread:$0]  %s220_s6, 128, %s377_s5, [#allocation4]  }
 0x19d   :  { %316 = dma.done.wait [#allocation4], 128  }
 0x19e   :  { %317 = vsyncadd [#allocation4], 4294967168 }
 0x19f   :  { %226 = vsyncpa [#allocation3], 1 }
 0x1a0   :  { %227 = vsyncpa [#allocation4], 1 }

</bundles_post_ra>
